<compile_context>
chip_gen: v5e
topology: v5e:2x2
jax: 0.10.0
libtpu: 0.0.40
codegen_flags: <defaults>
</compile_context>

<pallas_src>
import functools
import math

import jax
import jax.numpy as jnp
from jax import lax
from jax.experimental import pallas as pl
from jax.experimental.pallas import tpu as pltpu


def _cdiv(a, b):
    return -(-a // b)


def _round_up(x, m):
    return _cdiv(x, m) * m


def _pick_tile(dim, max_tile, align):
    """Tile size <= ~max_tile (aligned) minimizing padding waste.

    Returns (tile, num_blocks, padded_dim) with num_blocks*tile >= dim.
    """
    dim_al = _round_up(dim, align)
    nblk = _cdiv(dim_al, max_tile)
    tile = _round_up(_cdiv(dim_al, nblk), align)
    return tile, nblk, nblk * tile


def _equal_linear_kernel(*refs, k_tiled, has_bias, scale, bias_mul,
                         fuse_lrelu, negative_slope):
    def matmul(x_ref, w_ref):
        # x: (tm, tk), w: (tn, tk) in its native (out_dim, in_dim) layout.
        # Contract the shared K axis -> (tm, tn); output stays lane-dense in N.
        return lax.dot_general(
            x_ref[...], w_ref[...],
            dimension_numbers=(((1,), (1,)), ((), ())),
            preferred_element_type=jnp.float32)

    def epilogue(acc, b_ref, o_ref):
        # `scale` / `bias_mul` already carry the sqrt(2) activation gain.
        out = acc * scale
        if has_bias:
            out = out + b_ref[...].astype(jnp.float32) * bias_mul
        if fuse_lrelu:
            out = jnp.where(out >= 0.0, out, out * negative_slope)
        o_ref[...] = out.astype(o_ref.dtype)

    if k_tiled:
        if has_bias:
            x_ref, w_ref, b_ref, o_ref, acc_ref = refs
        else:
            x_ref, w_ref, o_ref, acc_ref = refs
            b_ref = None

        k = pl.program_id(2)

        @pl.when(k == 0)
        def _():
            acc_ref[...] = jnp.zeros_like(acc_ref)

        acc_ref[...] += matmul(x_ref, w_ref)

        @pl.when(k == pl.num_programs(2) - 1)
        def _():
            epilogue(acc_ref[...], b_ref, o_ref)
    else:
        # Resident-weight fast path: whole W (and bias) live in VMEM, grid is
        # only over M, no accumulator scratch needed.
        if has_bias:
            x_ref, w_ref, b_ref, o_ref = refs
        else:
            x_ref, w_ref, o_ref = refs
            b_ref = None
        epilogue(matmul(x_ref, w_ref), b_ref, o_ref)


def equal_linear(x, weight, bias=None, *, lr_mul=1.0, activation=None,
                 tm=256, tn=512, tk=512, compute_dtype=None,
                 max_resident_weight_bytes=4 << 20):
    """Pallas TPU forward pass of StyleGAN2 EqualLinear.

    x: (..., in_dim); weight: (out_dim, in_dim); bias: (out_dim,) or None.
    compute_dtype=jnp.bfloat16 uses bf16 MXU operands with f32 accumulation
    (faster / half the HBM bytes, reduced precision).
    """
    out_dim, in_dim = weight.shape
    orig_lead = x.shape[:-1]
    out_dtype = x.dtype
    x2 = x.reshape(-1, in_dim)
    M, K = x2.shape
    N = out_dim

    fuse_lrelu = (activation == "fused_lrelu")
    act_gain = math.sqrt(2.0) if fuse_lrelu else 1.0
    # Fold scale, lr_mul and the activation gain into two scalars
    # (valid because act_gain > 0).
    scale_eff = (1.0 / math.sqrt(in_dim)) * lr_mul * act_gain
    bias_eff = float(lr_mul) * act_gain
    has_bias = bias is not None

    if compute_dtype is not None:
        x2 = x2.astype(compute_dtype)
        weight = weight.astype(compute_dtype)

    x_item = x2.dtype.itemsize
    w_item = weight.dtype.itemsize
    o_item = out_dtype.itemsize

    # Minimal hardware alignment (8 sublanes x 128 lanes).
    M_al = _round_up(M, 8)
    N_al = _round_up(N, 128)
    K_al = _round_up(K, 128)

    # ---- strategy selection ------------------------------------------------
    tm_r, nbm_r, Mp_r = _pick_tile(M, tm, 8)
    if nbm_r < 2 and M_al >= 16:          # keep both v7x TensorCores busy
        nbm_r = 2
        tm_r = _round_up(_cdiv(M_al, 2), 8)
        Mp_r = nbm_r * tm_r
    vmem_resident = (2 * (tm_r * K_al * x_item + N_al * K_al * w_item
                          + tm_r * N_al * o_item) + 2 * N_al * 4)
    use_resident = (N_al * K_al * w_item <= max_resident_weight_bytes
                    and vmem_resident <= (24 << 20))

    if use_resident:
        tm_ = tm_r
        M_pad, N_pad, K_pad = Mp_r, N_al, K_al
        grid = (M_pad // tm_,)
        dim_sem = ("parallel",)
        in_specs = [
            pl.BlockSpec((tm_, K_pad), lambda i: (i, 0)),      # x row-block
            pl.BlockSpec((N_pad, K_pad), lambda i: (0, 0)),    # whole weight
        ]
        if has_bias:
            in_specs.append(pl.BlockSpec((1, N_pad), lambda i: (0, 0)))
        out_spec = pl.BlockSpec((tm_, N_pad), lambda i: (i, 0))
        scratch = []
    else:
        tm_, nbm, M_pad = _pick_tile(M, tm, 8)
        tn_, nbn, N_pad = _pick_tile(N, tn, 128)
        tk_, nbk, K_pad = _pick_tile(K, tk, 128)
        if nbm * nbn < 2:                  # megacore: >= 2 parallel blocks
            if M_al >= 16:
                nbm = 2
                tm_ = _round_up(_cdiv(M_al, 2), 8)
                M_pad = nbm * tm_
            elif N_al >= 256:
                nbn = 2
                tn_ = _round_up(_cdiv(N_al, 2), 128)
                N_pad = nbn * tn_
        grid = (nbm, nbn, nbk)
        dim_sem = ("parallel", "parallel", "arbitrary")
        in_specs = [
            pl.BlockSpec((tm_, tk_), lambda i, j, k: (i, k)),   # x tile
            pl.BlockSpec((tn_, tk_), lambda i, j, k: (j, k)),   # native W tile
        ]
        if has_bias:
            in_specs.append(pl.BlockSpec((1, tn_), lambda i, j, k: (0, j)))
        out_spec = pl.BlockSpec((tm_, tn_), lambda i, j, k: (i, j))
        scratch = [pltpu.VMEM((tm_, tn_), jnp.float32)]

    # ---- pad only when actually misaligned ----------------------------------
    x_p = x2 if (M_pad, K_pad) == (M, K) else jnp.pad(
        x2, ((0, M_pad - M), (0, K_pad - K)))
    w_p = weight if (N_pad, K_pad) == (N, K) else jnp.pad(
        weight, ((0, N_pad - N), (0, K_pad - K)))
    operands = [x_p, w_p]
    if has_bias:
        b2 = bias.reshape(1, N).astype(jnp.float32)
        b_p = b2 if N_pad == N else jnp.pad(b2, ((0, 0), (0, N_pad - N)))
        operands.append(b_p)

    kernel = functools.partial(
        _equal_linear_kernel,
        k_tiled=not use_resident,
        has_bias=has_bias,
        scale=scale_eff,
        bias_mul=bias_eff,
        fuse_lrelu=fuse_lrelu,
        negative_slope=0.2,
    )

    cost = pl.CostEstimate(
        flops=2 * M * N * K,
        transcendentals=0,
        bytes_accessed=(M * K * x_item + N * K * w_item + M * N * o_item
                        + (N * 4 if has_bias else 0)),
    )

    out_p = pl.pallas_call(
        kernel,
        out_shape=jax.ShapeDtypeStruct((M_pad, N_pad), out_dtype),
        grid_spec=pltpu.PrefetchScalarGridSpec(
            num_scalar_prefetch=0,
            grid=grid,
            in_specs=in_specs,
            out_specs=out_spec,
            scratch_shapes=scratch,
        ),
        compiler_params=pltpu.CompilerParams(
            dimension_semantics=dim_sem,
            vmem_limit_bytes=32 * 1024 * 1024,   # safe on v5e/v6e/v7x
        ),
        cost_estimate=cost,
    )(*operands)

    out = out_p if (M_pad, N_pad) == (M, N) else out_p[:M, :N]
    return out.reshape(*orig_lead, out_dim)


if __name__ == "__main__":
    key = jax.random.PRNGKey(0)
    lr_mul = 0.01
    k1, k2, k3, k4 = jax.random.split(key, 4)

    # Mirror the PyTorch init: weight ~ N(0,1) / lr_mul, bias = bias_init.
    in_dim, out_dim, batch = 32, 32, 2
    weight = jax.random.normal(k1, (out_dim, in_dim), jnp.float32) / lr_mul
    bias = jnp.full((out_dim,), 0.1, jnp.float32)
    x = jax.random.normal(k2, (batch, in_dim), jnp.float32)

    scale = (1.0 / math.sqrt(in_dim)) * lr_mul

    def ref_forward(xx, w, b, s, lm, activation):
        pre = xx @ (w * s).T
        if b is not None:
            pre = pre + b * lm
        if activation == "fused_lrelu":
            return jnp.where(pre >= 0, pre, 0.2 * pre) * math.sqrt(2.0)
        return pre

    # 1) activation=None (resident-weight fast path).
    out = jax.block_until_ready(
        equal_linear(x, weight, bias, lr_mul=lr_mul, activation=None))
    ref = ref_forward(x, weight, bias, scale, lr_mul, None)
    assert out.shape == ref.shape and out.dtype == x.dtype
    assert jnp.allclose(out, ref, atol=1e-4, rtol=1e-4)

    # 2) activation="fused_lrelu".
    out = jax.block_until_ready(
        equal_linear(x, weight, bias, lr_mul=lr_mul, activation="fused_lrelu"))
    ref = ref_forward(x, weight, bias, scale, lr_mul, "fused_lrelu")
    assert jnp.allclose(out, ref, atol=1e-4, rtol=1e-4)

    # 3) K-tiled accumulator path (forced), bias=None, non-aligned dims,
    #    extra leading batch dims.
    in2, out2 = 40, 48
    w2 = jax.random.normal(k3, (out2, in2), jnp.float32)
    x2 = jax.random.normal(k4, (2, 3, in2), jnp.float32)
    ref2 = ref_forward(x2, w2, None, 1.0 / math.sqrt(in2), 1.0, None)
    out2_k = jax.block_until_ready(
        equal_linear(x2, w2, None, lr_mul=1.0, activation=None,
                     max_resident_weight_bytes=0))  # force K-tiled path
    assert out2_k.shape == (2, 3, out2)
    assert jnp.allclose(out2_k, ref2, atol=1e-4, rtol=1e-4)

    # 4) bf16 MXU-operand path (reduced precision) — smoke test only.
    out_bf16 = jax.block_until_ready(
        equal_linear(x, weight, bias, lr_mul=lr_mul, activation="fused_lrelu",
                     compute_dtype=jnp.bfloat16))
    assert out_bf16.shape == (batch, out_dim)
    assert bool(jnp.all(jnp.isfinite(out_bf16)))

    print("KERNEL_OK")
</pallas_src>

<mosaic_0001>
module attributes {stable_mosaic.version = 11 : i64} {
  func.func @_equal_linear_kernel(%arg0: i32, %arg1: memref<8x128xf32, #tpu.memory_space<vmem>>, %arg2: memref<128x128xf32, #tpu.memory_space<vmem>>, %arg3: memref<1x128xf32, #tpu.memory_space<vmem>>, %arg4: memref<8x128xf32, #tpu.memory_space<vmem>>) attributes {dimension_semantics = [#tpu.dimension_semantics<parallel>], iteration_bounds = array<i64: 1>, scalar_prefetch = 0 : i64, scratch_operands = 0 : i64, tpu.core_type = #tpu.core_type<tc>, window_params = [{transform_indices = @transform_0, window_bounds = array<i64: 8, 128>}, {pipeline_mode = #tpu.pipeline_mode<synchronous>, transform_indices = @transform_1, window_bounds = array<i64: 128, 128>}, {pipeline_mode = #tpu.pipeline_mode<synchronous>, transform_indices = @transform_2, window_bounds = array<i64: 1, 128>}, {transform_indices = @transform_3, window_bounds = array<i64: 8, 128>}]} {
    %c0 = arith.constant 0 : index
    %c0_0 = arith.constant 0 : index
    %0 = vector.load %arg1[%c0, %c0_0] : memref<8x128xf32, #tpu.memory_space<vmem>>, vector<8x128xf32>
    %c0_1 = arith.constant 0 : index
    %c0_2 = arith.constant 0 : index
    %1 = vector.load %arg2[%c0_1, %c0_2] : memref<128x128xf32, #tpu.memory_space<vmem>>, vector<128x128xf32>
    %cst = arith.constant dense<0.000000e+00> : vector<8x128xf32>
    %2 = tpu.matmul %0, %1, %cst {dimension_numbers = #tpu.dot_dimension_numbers<[1], [1], [0], [0], [0, 0, 1, 0], [], []>} : vector<8x128xf32>, vector<128x128xf32>, vector<8x128xf32> -> vector<8x128xf32>
    %cst_3 = arith.constant 0.00176776689 : f32
    %3 = vector.broadcast %cst_3 : f32 to vector<8x128xf32>
    %4 = arith.mulf %2, %3 : vector<8x128xf32>
    %c0_4 = arith.constant 0 : index
    %c0_5 = arith.constant 0 : index
    %5 = vector.load %arg3[%c0_4, %c0_5] : memref<1x128xf32, #tpu.memory_space<vmem>>, vector<1x128xf32>
    %cst_6 = arith.constant 0.00999999977 : f32
    %6 = vector.broadcast %cst_6 : f32 to vector<1x128xf32>
    %7 = arith.mulf %5, %6 : vector<1x128xf32>
    %8 = vector.broadcast %7 : vector<1x128xf32> to vector<8x128xf32>
    %9 = arith.addf %4, %8 : vector<8x128xf32>
    %c0_7 = arith.constant 0 : index
    %c0_8 = arith.constant 0 : index
    %10 = vector.load %arg4[%c0_7, %c0_8] : memref<8x128xf32, #tpu.memory_space<vmem>>, vector<8x128xf32>
    tpu.vector_store %arg4[%c0_7, %c0_8], %9 {strides = array<i32>} : memref<8x128xf32, #tpu.memory_space<vmem>>, vector<8x128xf32>,
    return
  }
  func.func @transform_0(%arg0: i32) -> (i32, i32) {
    %c0_i32 = arith.constant 0 : i32
    %c0_i32_0 = arith.constant 0 : i32
    return %arg0, %c0_i32 : i32, i32
  }
  func.func @transform_1(%arg0: i32) -> (i32, i32) {
    %c0_i32 = arith.constant 0 : i32
    %c0_i32_0 = arith.constant 0 : i32
    %c0_i32_1 = arith.constant 0 : i32
    return %c0_i32, %c0_i32_0 : i32, i32
  }
  func.func @transform_2(%arg0: i32) -> (i32, i32) {
    %c0_i32 = arith.constant 0 : i32
    %c0_i32_0 = arith.constant 0 : i32
    %c0_i32_1 = arith.constant 0 : i32
    return %c0_i32, %c0_i32_0 : i32, i32
  }
  func.func @transform_3(%arg0: i32) -> (i32, i32) {
    %c0_i32 = arith.constant 0 : i32
    %c0_i32_0 = arith.constant 0 : i32
    return %arg0, %c0_i32 : i32, i32
  }
}

</mosaic_0001>

<bundles_post_ra>
// kernel: tpu_custom_call.1
= control target key start
LH: loop header
LB: loop body
LE: loop exit
PB: predicated region body
PF: predicated region fallthrough
CT: control target
= control target key end

     0   :  { %8 = vsyncpa [#allocation3], 0  ;;  %s228_s0 = inlined_call_operand.hbm [shape: f32[8,128], index: 0, kind: input, shape index: {}]   ;;  %s229_s1 = inlined_call_operand.hbm [shape: f32[128,128], index: 1, kind: input, shape index: {}]   ;;  %s230_s2 = inlined_call_operand.vmem [shape: f32[1,128], index: 2, kind: input, shape index: {}]   ;;  %s231_s3 = inlined_call_operand.hbm [shape: f32[8,128], index: 3, kind: output, shape index: {}]  }
   0x1   :  { %9 = vsyncpa [#allocation6], 0 }
   0x2   :  { %10 = vsyncpa [#allocation4], 0  ;;  %s16_s14 = sshll.u32 %s228_s0, 4  ;;  %s191_s15 = smov [#allocation2]   ;;  %s17_s14 = int_to_ptr.hbm [resolvable:$true] %s16_s14 }
   0x3   :  { %s18_s16 = sshll.u32 %s191_s15, 4  ;;  %s26_s19 = sshll.u32 %s229_s1, 4  ;;  %s19_s16 = int_to_ptr.vmem [resolvable:$true] %s18_s16  ;;  %s27_s19 = int_to_ptr.hbm [resolvable:$true] %s26_s19 }
   0x4   :  { %21 = dma.hbm_to_vmem [thread:$0]  %s17_s14, 128, %s19_s16, [#allocation3]  }
   0x5   :  { %s192_s20 = smov [#allocation5]   ;;  %s193_s22 = smov 128  }
   0x6   :  { %s28_s21 = sshll.u32 %s192_s20, 4  ;;  %s194_s23 = smov 8   ;;  %s29_s21 = int_to_ptr.vmem [resolvable:$true] %s28_s21 }
   0x7   :  { %34 = dma.hbm_to_vmem [thread:$0]  %s27_s19, 2048, %s29_s21, [#allocation6], %s193_s22, %s193_s22, %s194_s23  }
   0x8   :  { %185 = dma.done.wait [#allocation3], 128  }
   0x9   :  { %186 = vsyncadd [#allocation3], 4294967168 }
   0xa   :  { %187 = dma.done.wait [#allocation6], 2048  }
   0xb   :  { %188 = vsyncadd [#allocation6], 4294965248  ;;  %v61_v0 = vld [vmem:[#allocation5 + $0x78] sm:$0xff]  ;;  %v60_v1 = vld [vmem:[#allocation5 + $0x70] sm:$0xff]  ;;  %s195_s24 = smov [#allocation7]   ;;  %s97_s28 = sshll.u32 %s231_s3, 4  ;;  %s98_s28 = int_to_ptr.hbm [resolvable:$true] %s97_s28 }
   0xc   :  { %62 = vmatpush.xpose.msra.mxu0 %v61_v0  ;;  %v59_v2 = vld [vmem:[#allocation5 + $0x68] sm:$0xff]  ;;  %v58_v3 = vld [vmem:[#allocation5 + $0x60] sm:$0xff]  ;;  %v57_v4 = vld [vmem:[#allocation5 + $0x58] sm:$0xff]  ;;  %s95_s25 = sshll.u32 %s195_s24, 4  ;;  %s96_s25 = int_to_ptr.vmem [resolvable:$true] %s95_s25 }
   0xd   :  { %v56_v5 = vld [vmem:[#allocation5 + $0x50] sm:$0xff]  ;;  %v55_v6 = vld [vmem:[#allocation5 + $0x48] sm:$0xff]  ;;  %v54_v7 = vld [vmem:[#allocation5 + $0x40] sm:$0xff] }
   0xe   :  { %v53_v8 = vld [vmem:[#allocation5 + $0x38] sm:$0xff]  ;;  %v52_v9 = vld [vmem:[#allocation5 + $0x30] sm:$0xff]  ;;  %v51_v10 = vld [vmem:[#allocation5 + $0x28] sm:$0xff] }
   0xf   :  { %v50_v11 = vld [vmem:[#allocation5 + $0x20] sm:$0xff]  ;;  %v49_v12 = vld [vmem:[#allocation5 + $0x18] sm:$0xff]  ;;  %v48_v13 = vld [vmem:[#allocation5 + $0x10] sm:$0xff] }
  0x10   :  { %63 = vmatpush.xpose.msra.mxu0 %v60_v1  ;;  %v47_v14 = vld [vmem:[#allocation5 + $0x8] sm:$0xff]  ;;  %v46_v15 = vld [vmem:[#allocation5] sm:$0xff]  ;;  %v45_v16 = vld [vmem:[#allocation2] sm:$0xff] }
  0x11   :  { %v83_v17 = vld [vmem:[%s230_s2] sm:$0x1] }
  0x12   :  { %v84_v18 = vmul.f32 0.01, %v83_v17 }
  0x14   :  { %64 = vmatpush.xpose.msra.mxu0 %v59_v2  ;;  %v86_v19 = vperm.slane %v84_v18, 0 }
  0x18   :  { %65 = vmatpush.xpose.msra.mxu0 %v58_v3 }
  0x1c   :  { %66 = vmatpush.xpose.msra.mxu0 %v57_v4 }
  0x20   :  { %67 = vmatpush.xpose.msra.mxu0 %v56_v5 }
  0x24   :  { %68 = vmatpush.xpose.msra.mxu0 %v55_v6 }
  0x28   :  { %69 = vmatpush.xpose.msra.mxu0 %v54_v7 }
  0x2c   :  { %70 = vmatpush.xpose.msra.mxu0 %v53_v8 }
  0x30   :  { %71 = vmatpush.xpose.msra.mxu0 %v52_v9 }
  0x34   :  { %72 = vmatpush.xpose.msra.mxu0 %v51_v10 }
  0x38   :  { %73 = vmatpush.xpose.msra.mxu0 %v50_v11 }
  0x3c   :  { %74 = vmatpush.xpose.msra.mxu0 %v49_v12 }
  0x40   :  { %75 = vmatpush.xpose.msra.mxu0 %v48_v13 }
  0x44   :  { %76 = vmatpush.xpose.msra.mxu0 %v47_v14 }
  0x48   :  { %77 = vmatpush.xpose.msra.mxu0 %v46_v15 }
  0x4b   :  { %78 = vmatmul.f32.vlgmr.msra.gmra.mxu0 %v45_v16 }
  0xc8   :  { %v79_v20 = vpop.f32.mrf.mxu0 }
  0xc9   :  { %v82_v21 = vmul.f32 0.0017677669, %v79_v20 }
  0xcb   :  { %v88_v22 = vadd.f32 %v86_v19, %v82_v21 }
  0xcd   :  { %89 = vst [vmem:[#allocation7] sm:$0xff] %v88_v22 }
  0xce   :  { %100 = dma.vmem_to_hbm [thread:$0]  %s96_s25, 128, %s98_s28, [#allocation4]  }
  0xcf   :  { %189 = dma.done.wait [#allocation4], 128  }
  0xd0   :  { %190 = vsyncadd [#allocation4], 4294967168 }
  0xd1   :  { %105 = vsyncpa [#allocation3], 1 }
  0xd2   :  { %106 = vsyncpa [#allocation6], 1 }
  0xd3   :  { %107 = vsyncpa [#allocation4], 1 }

</bundles_post_ra>
